<compile_context>
chip_gen: v7x
topology: tpu7x:2x2x1
jax: 0.10.0
libtpu: 0.0.40
codegen_flags: <defaults>
</compile_context>

<pallas_src>
import functools

import jax
import jax.numpy as jnp
from jax import lax
from jax.experimental import pallas as pl
from jax.experimental.pallas import tpu as pltpu

_LANE = 128
_CHUNK_ROWS = 1024              # rows per in-kernel strip (~0.5 MiB f32 temporaries)
_TARGET_STEP_BYTES = 8 << 20    # ~8 MiB of HBM traffic per grid step (both inputs)
_VMEM_LIMIT_BYTES = 32 << 20    # covers <=16 MiB of double-buffered inputs everywhere


def _probably_two_tensorcores() -> bool:
    """Best-effort check for a 2-TensorCore chip (v7x). Safe default: False."""
    try:
        kind = str(jax.devices()[0].device_kind).lower().replace(" ", "")
    except Exception:
        return False
    return ("v7" in kind) or ("tpu7" in kind)


def _dice_kernel(p_ref, l_ref, inter_ref, den_ref, *,
                 steps, block_rows, chunk_rows, total_rows,
                 first_masked_blk, has_masked_path):
    i = pl.program_id(1)                       # inner "arbitrary" reduction axis
    n_chunks = block_rows // chunk_rows
    folds = chunk_rows // 8

    @pl.when(i == 0)
    def _init():
        inter_ref[...] = jnp.zeros_like(inter_ref)
        den_ref[...] = jnp.zeros_like(den_ref)

    def _accum(p, l):
        # Fold to (folds, 8, 128) and reduce over axis 0: per-vreg VPU adds only
        # (no cross-sublane XLU reduce), and the (8, 128) accumulator update is a
        # full-vreg unmasked store into the resident output block.
        pf = p.reshape(folds, 8, _LANE)
        lf = l.reshape(folds, 8, _LANE)
        inter_ref[...] += jnp.sum(pf * lf, axis=0)   # intersection partials
        den_ref[...] += jnp.sum(pf + lf, axis=0)     # sum(p) + sum(l) partials

    def _plain_chunk(c):
        off = c * chunk_rows                   # static, multiple of 8
        _accum(p_ref[off:off + chunk_rows, :].astype(jnp.float32),
               l_ref[off:off + chunk_rows, :].astype(jnp.float32))

    if not has_masked_path:
        # Steady state: ~upcast + mul + adds per element, no masking anywhere.
        for c in range(n_chunks):
            _plain_chunk(c)
    else:
        blk = pl.program_id(0) * steps + i     # assigned (unclamped) block index

        @pl.when(blk < first_masked_blk)
        def _steady_state():
            for c in range(n_chunks):
                _plain_chunk(c)

        @pl.when(blk >= first_masked_blk)
        def _boundary():
            # Boundary (partial) block and clamped dummy steps: rows past the end
            # of the array are zeroed before contributing to either sum.
            base = blk * block_rows
            for c in range(n_chunks):
                off = c * chunk_rows
                p = p_ref[off:off + chunk_rows, :].astype(jnp.float32)
                l = l_ref[off:off + chunk_rows, :].astype(jnp.float32)
                rid = base + off + lax.broadcasted_iota(jnp.int32, p.shape, 0)
                valid = rid < total_rows
                _accum(jnp.where(valid, p, 0.0), jnp.where(valid, l, 0.0))


def dice_loss(probas, labels, smooth=1.0):
    """DiceLoss.forward (per_image=False): global dice coefficient."""
    n = probas.size
    if n == 0:
        return jnp.zeros((), jnp.float32)      # matches `probas * 0.0` for empty input

    p_flat = probas.reshape(-1)
    l_flat = labels.reshape(-1)

    lane_tail = n % _LANE
    n_main = n - lane_tail
    rows = n_main // _LANE

    # <128-element lane tail: summed by XLA in the wrapper (no pad pass over HBM).
    if lane_tail:
        tp = p_flat[n_main:].astype(jnp.float32)
        tl = l_flat[n_main:].astype(jnp.float32)
        inter_tail = jnp.sum(tp * tl)
        den_tail = jnp.sum(tp) + jnp.sum(tl)
    else:
        inter_tail = jnp.float32(0.0)
        den_tail = jnp.float32(0.0)

    if rows < 8:
        # Too small for a kernel launch to make sense; plain XLA reduction.
        mp = p_flat[:n_main].astype(jnp.float32)
        ml = l_flat[:n_main].astype(jnp.float32)
        inter = jnp.sum(mp * ml) + inter_tail
        den = jnp.sum(mp) + jnp.sum(ml) + den_tail
        return (2.0 * inter + smooth) / (den + smooth)

    pm = p_flat[:n_main] if lane_tail else p_flat
    lm = l_flat[:n_main] if lane_tail else l_flat
    p2 = pm.reshape(rows, _LANE)
    l2 = lm.reshape(rows, _LANE)

    # --- Block sizing: dtype-aware, ~8 MiB of combined HBM traffic per step,
    # block_rows a multiple of 8 (and of the chunk size) and never larger than rows.
    combined_itemsize = p2.dtype.itemsize + l2.dtype.itemsize
    max_rows = max(8, (_TARGET_STEP_BYTES // (combined_itemsize * _LANE)) // 8 * 8)
    block_rows = min(max_rows, (rows // 8) * 8)
    if block_rows > _CHUNK_ROWS:
        block_rows = (block_rows // _CHUNK_ROWS) * _CHUNK_ROWS
        chunk_rows = _CHUNK_ROWS
    else:
        chunk_rows = block_rows

    blocks_total = pl.cdiv(rows, block_rows)
    partial_last = (rows % block_rows) != 0

    # 2-way split of the stream across TensorCores (helps v7x).  On single-TC or
    # unknown chips it is only enabled when it costs nothing (no dummy overflow
    # step, i.e. an even block count).
    if blocks_total >= 2 and (_probably_two_tensorcores() or blocks_total % 2 == 0):
        num_slices = 2
    else:
        num_slices = 1
    steps = pl.cdiv(blocks_total, num_slices)
    overflow = num_slices * steps > blocks_total

    has_masked_path = partial_last or overflow
    first_masked_blk = blocks_total - 1 if partial_last else blocks_total

    if overflow:
        # Dummy steps re-read the last real block; their assigned (unclamped) block
        # index places every row past `rows`, so the row mask zeroes them.
        def in_map(s, i):
            return (jnp.minimum(s * steps + i, blocks_total - 1), 0)
    else:
        def in_map(s, i):
            return (s * steps + i, 0)

    kernel = functools.partial(
        _dice_kernel,
        steps=steps,
        block_rows=block_rows,
        chunk_rows=chunk_rows,
        total_rows=rows,
        first_masked_blk=first_masked_blk,
        has_masked_path=has_masked_path,
    )

    out_rows = num_slices * 8
    inter_p, den_p = pl.pallas_call(
        kernel,
        out_shape=(
            jax.ShapeDtypeStruct((out_rows, _LANE), jnp.float32),
            jax.ShapeDtypeStruct((out_rows, _LANE), jnp.float32),
        ),
        grid_spec=pltpu.PrefetchScalarGridSpec(
            num_scalar_prefetch=0,
            grid=(num_slices, steps),
            in_specs=[
                pl.BlockSpec((block_rows, _LANE), in_map),
                pl.BlockSpec((block_rows, _LANE), in_map),
            ],
            out_specs=[
                pl.BlockSpec((8, _LANE), lambda s, i: (s, 0)),
                pl.BlockSpec((8, _LANE), lambda s, i: (s, 0)),
            ],
        ),
        compiler_params=pltpu.CompilerParams(
            # Leading axis shards the stream across TensorCores on v7x; harmless
            # sequential loop on single-TC chips.
            dimension_semantics=("parallel", "arbitrary"),
            vmem_limit_bytes=_VMEM_LIMIT_BYTES,
        ),
        cost_estimate=pl.CostEstimate(
            flops=4 * rows * _LANE,
            transcendentals=0,
            bytes_accessed=p2.nbytes + l2.nbytes + 2 * out_rows * _LANE * 4,
        ),
    )(p2, l2)

    # Tiny final combine (per-slice, per-vreg partials -> scalars) outside the kernel.
    inter = jnp.sum(inter_p) + inter_tail
    den = jnp.sum(den_p) + den_tail
    return (2.0 * inter + smooth) / (den + smooth)


def dice_loss_reference(probas, labels, smooth=1.0):
    p = probas.astype(jnp.float32).reshape(-1)
    l = labels.astype(jnp.float32).reshape(-1)
    inter = jnp.sum(p * l)
    return (2.0 * inter + smooth) / (jnp.sum(p) + jnp.sum(l) + smooth)


if __name__ == "__main__":
    key = jax.random.PRNGKey(0)

    def make_inputs(k, B, C, T, H, W):
        kp, kl = jax.random.split(k)
        logits = jax.random.normal(kp, (B, C, T, H, W), dtype=jnp.float32)
        probas = jax.nn.softmax(logits, axis=1)           # class-probability tensor
        cls = jax.random.randint(kl, (B, T, H, W), 0, C)
        labels = jnp.moveaxis(jax.nn.one_hot(cls, C, dtype=jnp.float32), -1, 1)
        return probas, labels

    k1, k2 = jax.random.split(key)

    # Main case: (B, C, T, H, W) = (2, 4, 3, 16, 16) -> 6144 elements (lane-aligned,
    # single full block, unmasked steady-state path).
    probas, labels = make_inputs(k1, 2, 4, 3, 16, 16)
    out = jax.block_until_ready(dice_loss(probas, labels))
    ref = jax.block_until_ready(dice_loss_reference(probas, labels))
    assert jnp.allclose(out, ref, rtol=1e-5, atol=1e-5), (out, ref)

    # Second case exercises the 2-slice split + masked boundary block:
    # 1*4*1*10*160 = 6400 elements -> 50 rows of 128 with 48-row blocks.
    probas2, labels2 = make_inputs(k2, 1, 4, 1, 10, 160)
    out2 = jax.block_until_ready(dice_loss(probas2, labels2))
    ref2 = jax.block_until_ready(dice_loss_reference(probas2, labels2))
    assert jnp.allclose(out2, ref2, rtol=1e-5, atol=1e-5), (out2, ref2)

    print("KERNEL_OK")
</pallas_src>

<mosaic_0001>
module attributes {stable_mosaic.version = 11 : i64} {
  func.func @_dice_kernel(%arg0: i32, %arg1: i32, %arg2: memref<48x128xf32, #tpu.memory_space<vmem>>, %arg3: memref<48x128xf32, #tpu.memory_space<vmem>>, %arg4: memref<8x128xf32, #tpu.memory_space<vmem>>, %arg5: memref<8x128xf32, #tpu.memory_space<vmem>>) attributes {dimension_semantics = [#tpu.dimension_semantics<parallel>, #tpu.dimension_semantics<arbitrary>], iteration_bounds = array<i64: 1, 1>, scalar_prefetch = 0 : i64, scratch_operands = 0 : i64, tpu.core_type = #tpu.core_type<tc>, window_params = [{transform_indices = @transform_0, window_bounds = array<i64: 48, 128>}, {transform_indices = @transform_1, window_bounds = array<i64: 48, 128>}, {transform_indices = @transform_2, window_bounds = array<i64: 8, 128>}, {transform_indices = @transform_3, window_bounds = array<i64: 8, 128>}]} {
    %c0_i32 = arith.constant 0 : i32
    %0 = arith.cmpi eq, %arg1, %c0_i32 : i32
    %1 = arith.extui %0 : i1 to i32
    %c0_i32_0 = arith.constant 0 : i32
    %2 = arith.cmpi ne, %1, %c0_i32_0 : i32
    scf.if %2 {
      %cst_13 = arith.constant 0.000000e+00 : f32
      %17 = vector.broadcast %cst_13 : f32 to vector<8x128xf32>
      %c0_14 = arith.constant 0 : index
      %c0_15 = arith.constant 0 : index
      %18 = vector.load %arg4[%c0_14, %c0_15] : memref<8x128xf32, #tpu.memory_space<vmem>>, vector<8x128xf32>
      tpu.vector_store %arg4[%c0_14, %c0_15], %17 {strides = array<i32>} : memref<8x128xf32, #tpu.memory_space<vmem>>, vector<8x128xf32>,
      %cst_16 = arith.constant 0.000000e+00 : f32
      %19 = vector.broadcast %cst_16 : f32 to vector<8x128xf32>
      %c0_17 = arith.constant 0 : index
      %c0_18 = arith.constant 0 : index
      %20 = vector.load %arg5[%c0_17, %c0_18] : memref<8x128xf32, #tpu.memory_space<vmem>>, vector<8x128xf32>
      tpu.vector_store %arg5[%c0_17, %c0_18], %19 {strides = array<i32>} : memref<8x128xf32, #tpu.memory_space<vmem>>, vector<8x128xf32>,
    } else {
    }
    %c0 = arith.constant 0 : index
    %c0_1 = arith.constant 0 : index
    %3 = vector.load %arg2[%c0, %c0_1] : memref<48x128xf32, #tpu.memory_space<vmem>>, vector<48x128xf32>
    %c0_2 = arith.constant 0 : index
    %c0_3 = arith.constant 0 : index
    %4 = vector.load %arg3[%c0_2, %c0_3] : memref<48x128xf32, #tpu.memory_space<vmem>>, vector<48x128xf32>
    %5 = vector.shape_cast %3 : vector<48x128xf32> to vector<6x8x128xf32>
    %6 = vector.shape_cast %4 : vector<48x128xf32> to vector<6x8x128xf32>
    %c0_4 = arith.constant 0 : index
    %c0_5 = arith.constant 0 : index
    %7 = vector.load %arg4[%c0_4, %c0_5] : memref<8x128xf32, #tpu.memory_space<vmem>>, vector<8x128xf32>
    %8 = arith.mulf %5, %6 : vector<6x8x128xf32>
    %cst = arith.constant dense<0.000000e+00> : vector<8x128xf32>
    %9 = vector.multi_reduction <add>, %8, %cst [0] : vector<6x8x128xf32> to vector<8x128xf32>
    %10 = arith.addf %7, %9 : vector<8x128xf32>
    %c0_6 = arith.constant 0 : index
    %c0_7 = arith.constant 0 : index
    %11 = vector.load %arg4[%c0_6, %c0_7] : memref<8x128xf32, #tpu.memory_space<vmem>>, vector<8x128xf32>
    tpu.vector_store %arg4[%c0_6, %c0_7], %10 {strides = array<i32>} : memref<8x128xf32, #tpu.memory_space<vmem>>, vector<8x128xf32>,
    %c0_8 = arith.constant 0 : index
    %c0_9 = arith.constant 0 : index
    %12 = vector.load %arg5[%c0_8, %c0_9] : memref<8x128xf32, #tpu.memory_space<vmem>>, vector<8x128xf32>
    %13 = arith.addf %5, %6 : vector<6x8x128xf32>
    %cst_10 = arith.constant dense<0.000000e+00> : vector<8x128xf32>
    %14 = vector.multi_reduction <add>, %13, %cst_10 [0] : vector<6x8x128xf32> to vector<8x128xf32>
    %15 = arith.addf %12, %14 : vector<8x128xf32>
    %c0_11 = arith.constant 0 : index
    %c0_12 = arith.constant 0 : index
    %16 = vector.load %arg5[%c0_11, %c0_12] : memref<8x128xf32, #tpu.memory_space<vmem>>, vector<8x128xf32>
    tpu.vector_store %arg5[%c0_11, %c0_12], %15 {strides = array<i32>} : memref<8x128xf32, #tpu.memory_space<vmem>>, vector<8x128xf32>,
    return
  }
  func.func @transform_0(%arg0: i32, %arg1: i32) -> (i32, i32) {
    %c1_i32 = arith.constant 1 : i32
    %0 = arith.muli %arg0, %c1_i32 : i32
    %1 = arith.addi %0, %arg1 : i32
    %c0_i32 = arith.constant 0 : i32
    %c0_i32_0 = arith.constant 0 : i32
    return %1, %c0_i32 : i32, i32
  }
  func.func @transform_1(%arg0: i32, %arg1: i32) -> (i32, i32) {
    %c1_i32 = arith.constant 1 : i32
    %0 = arith.muli %arg0, %c1_i32 : i32
    %1 = arith.addi %0, %arg1 : i32
    %c0_i32 = arith.constant 0 : i32
    %c0_i32_0 = arith.constant 0 : i32
    return %1, %c0_i32 : i32, i32
  }
  func.func @transform_2(%arg0: i32, %arg1: i32) -> (i32, i32) {
    %c0_i32 = arith.constant 0 : i32
    %c0_i32_0 = arith.constant 0 : i32
    return %arg0, %c0_i32 : i32, i32
  }
  func.func @transform_3(%arg0: i32, %arg1: i32) -> (i32, i32) {
    %c0_i32 = arith.constant 0 : i32
    %c0_i32_0 = arith.constant 0 : i32
    return %arg0, %c0_i32 : i32, i32
  }
}

</mosaic_0001>

<bundles_post_ra>
// kernel: tpu_custom_call.1
= control target key start
LH: loop header
LB: loop body
LE: loop exit
PB: predicated region body
PF: predicated region fallthrough
CT: control target
= control target key end

     0   :  { %9 = vsyncpa [#allocation3], 0  ;;  %s308_s0 = inlined_call_operand.hbm [shape: f32[48,128], index: 0, kind: input, shape index: {}]   ;;  %s309_s1 = inlined_call_operand.hbm [shape: f32[48,128], index: 1, kind: input, shape index: {}]   ;;  %s310_s2 = inlined_call_operand.hbm [shape: f32[8,128], index: 2, kind: output, shape index: {0}]   ;;  %s311_s3 = inlined_call_operand.hbm [shape: f32[8,128], index: 3, kind: output, shape index: {1}]  }
   0x1   :  { %10 = vsyncpa [#allocation6], 0 }
   0x2   :  { %11 = vsyncpa [#allocation4], 0 }
   0x3   :  { %12 = vsyncpa [#allocation9], 0  ;;  %s234_s12 = smov [#allocation2]   ;;  %s138_s16 = scalar_lea.hbm %s308_s0, 768 }
   0x4   :  { %s22_s13 = sshll.u32 %s234_s12, 4  ;;  %p139_p0 = scmp.ne.s32.totalorder %s308_s0, %s138_s16  ;;  %s23_s13 = int_to_ptr.vmem [resolvable:$true] %s22_s13 }
   0x5   :  { %p142_p1 = scmp.lt.u32.totalorder %s138_s16, %s308_s0 }
   0x7   :  { %p144_p2 = pnand %p142_p1, %p139_p0 }
   0x9   :  { %147 = shalt.err (!%p144_p2)
}
   0xa   :  { %s148_s21 = scalar_lea.vmem %s23_s13, 768  ;;  %p153_p4 = scmp.lt.s32.totalorder %s23_s13, %s23_s13 }
   0xb   :  { %p149_p3 = scmp.ne.s32.totalorder %s23_s13, %s148_s21  ;;  %p154_p5 = scmp.lt.s32.totalorder %s148_s21, %s148_s21 }
   0xd   :  { %p155_p6 = por %p154_p5, %p153_p4 }
   0xf   :  { %p156_p7 = pnand %p155_p6, %p149_p3 }
  0x11   :  { %159 = shalt.err (!%p156_p7)
}
  0x12   :  { %s235_s22 = smov 128   ;;  %s236_s23 = smov 8  }
  0x13   :  { %28 = dma.hbm_to_vmem [thread:$0]  %s308_s0, 768, %s23_s13, [#allocation3], %s235_s22, %s235_s22, %s236_s23  }
  0x14   :  { %s237_s26 = smov [#allocation5]   ;;  %s160_s30 = scalar_lea.hbm %s309_s1, 768 }
  0x15   :  { %s38_s27 = sshll.u32 %s237_s26, 4  ;;  %p161_p8 = scmp.ne.s32.totalorder %s309_s1, %s160_s30  ;;  %s39_s27 = int_to_ptr.vmem [resolvable:$true] %s38_s27 }
  0x16   :  { %p164_p9 = scmp.lt.u32.totalorder %s160_s30, %s309_s1 }
  0x18   :  { %p166_p10 = pnand %p164_p9, %p161_p8 }
  0x1a   :  { %169 = shalt.err (!%p166_p10)
}
  0x1b   :  { %s170_s8 = scalar_lea.vmem %s39_s27, 768  ;;  %p175_p12 = scmp.lt.s32.totalorder %s39_s27, %s39_s27 }
  0x1c   :  { %p171_p11 = scmp.ne.s32.totalorder %s39_s27, %s170_s8  ;;  %p176_p13 = scmp.lt.s32.totalorder %s170_s8, %s170_s8 }
  0x1e   :  { %p177_p0 = por %p176_p13, %p175_p12 }
  0x20   :  { %p178_p1 = pnand %p177_p0, %p171_p11 }
  0x22   :  { %181 = shalt.err (!%p178_p1)
}
  0x23   :  { %44 = dma.hbm_to_vmem [thread:$0]  %s309_s1, 768, %s39_s27, [#allocation6], %s235_s22, %s235_s22, %s236_s23  }
  0x24   :  { %226 = dma.done.wait [#allocation3], 768  }
  0x25   :  { %227 = vsyncadd [#allocation3], 4294966528 }
  0x26   :  { %228 = dma.done.wait [#allocation6], 768  }
  0x27   :  { %229 = vsyncadd [#allocation6], 4294966528  ;;  %v61_v0 = vld [vmem:[#allocation2] sm:$0xff]  ;;  %v62_v1 = vld [vmem:[#allocation2 + $0x8] sm:$0xff]  ;;  %s238_s1 = smov [#allocation7]   ;;  %s239_s11 = smov [#allocation8]  }
  0x28   :  { %v63_v2 = vld [vmem:[#allocation2 + $0x10] sm:$0xff]  ;;  %v64_v3 = vld [vmem:[#allocation2 + $0x18] sm:$0xff]  ;;  %v69_v6 = vld [vmem:[#allocation5 + $0x10] sm:$0xff]  ;;  %s107_s10 = sshll.u32 %s238_s1, 4  ;;  %s117_s12 = sshll.u32 %s239_s11, 4  ;;  %s108_s10 = int_to_ptr.vmem [resolvable:$true] %s107_s10  ;;  %s118_s12 = int_to_ptr.vmem [resolvable:$true] %s117_s12 }
  0x29   :  { %v67_v4 = vld [vmem:[#allocation5] sm:$0xff]  ;;  %v68_v5 = vld [vmem:[#allocation5 + $0x8] sm:$0xff]  ;;  %v70_v7 = vld [vmem:[#allocation5 + $0x18] sm:$0xff]  ;;  %v76_v10 = vmul.f32 %v69_v6, %v63_v2  ;;  %v90_v17 = vadd.f32 %v69_v6, %v63_v2  ;;  %s182_s13 = scalar_lea.vmem %s108_s10, 128  ;;  %p187_p3 = scmp.lt.s32.totalorder %s108_s10, %s108_s10 }
  0x2a   :  { %v74_v8 = vmul.f32 %v67_v4, %v61_v0  ;;  %v75_v9 = vmul.f32 %v68_v5, %v62_v1  ;;  %v88_v11 = vadd.f32 %v67_v4, %v61_v0  ;;  %v65_v12 = vld [vmem:[#allocation2 + $0x20] sm:$0xff]  ;;  %v71_v13 = vld [vmem:[#allocation5 + $0x20] sm:$0xff]  ;;  %v89_v14 = vadd.f32 %v68_v5, %v62_v1  ;;  %v66_v18 = vld [vmem:[#allocation2 + $0x28] sm:$0xff]  ;;  %p183_p2 = scmp.ne.s32.totalorder %s108_s10, %s182_s13  ;;  %p188_p4 = scmp.lt.s32.totalorder %s182_s13, %s182_s13 }
  0x2b   :  { %v77_v15 = vmul.f32 %v70_v7, %v64_v3  ;;  %v72_v19 = vld [vmem:[#allocation5 + $0x28] sm:$0xff]  ;;  %v91_v20 = vadd.f32 %v70_v7, %v64_v3  ;;  %v78_v22 = vmul.f32 %v71_v13, %v65_v12  ;;  %v92_v24 = vadd.f32 %v71_v13, %v65_v12 }
  0x2c   :  { %v80_v16 = vadd.f32 %v75_v9, %v74_v8  ;;  %v94_v21 = vadd.f32 %v89_v14, %v88_v11  ;;  %v79_v26 = vmul.f32 %v72_v19, %v66_v18  ;;  %v93_v28 = vadd.f32 %v72_v19, %v66_v18  ;;  %p189_p5 = por %p188_p4, %p187_p3 }
  0x2e   :  { %v81_v23 = vadd.f32 %v80_v16, %v76_v10  ;;  %v95_v25 = vadd.f32 %v94_v21, %v90_v17  ;;  %p190_p6 = pnand %p189_p5, %p183_p2 }
  0x30   :  { %v82_v27 = vadd.f32 %v81_v23, %v77_v15  ;;  %v96_v29 = vadd.f32 %v95_v25, %v91_v20 }
  0x32   :  { %v83_v30 = vadd.f32 %v82_v27, %v78_v22  ;;  %v97_v31 = vadd.f32 %v96_v29, %v92_v24 }
  0x34   :  { %v84_v32 = vadd.f32 %v83_v30, %v79_v26  ;;  %v98_v33 = vadd.f32 %v97_v31, %v93_v28 }
  0x36   :  { %86 = vst [vmem:[#allocation7] sm:$0xff] %v84_v32  ;;  %100 = vst [vmem:[#allocation8] sm:$0xff] %v98_v33 }
  0x37   :  { %193 = shalt.err (!%p190_p6)
}
  0x38   :  { %s194_s16 = scalar_lea.hbm %s310_s2, 128 }
  0x39   :  { %p195_p7 = scmp.ne.s32.totalorder %s310_s2, %s194_s16  ;;  %p198_p8 = scmp.lt.u32.totalorder %s194_s16, %s310_s2 }
  0x3b   :  { %p200_p9 = pnand %p198_p8, %p195_p7 }
  0x3d   :  { %203 = shalt.err (!%p200_p9)
}
  0x3e   :  { %110 = dma.vmem_to_hbm [thread:$0]  %s108_s10, 128, %s310_s2, [#allocation4]  }
  0x3f   :  { %s204_s23 = scalar_lea.vmem %s118_s12, 128  ;;  %p209_p11 = scmp.lt.s32.totalorder %s118_s12, %s118_s12 }
  0x40   :  { %p205_p10 = scmp.ne.s32.totalorder %s118_s12, %s204_s23  ;;  %p210_p12 = scmp.lt.s32.totalorder %s204_s23, %s204_s23 }
  0x42   :  { %p211_p13 = por %p210_p12, %p209_p11 }
  0x44   :  { %p212_p0 = pnand %p211_p13, %p205_p10 }
  0x46   :  { %215 = shalt.err (!%p212_p0)
}
  0x47   :  { %s216_s26 = scalar_lea.hbm %s311_s3, 128 }
  0x48   :  { %p217_p1 = scmp.ne.s32.totalorder %s311_s3, %s216_s26  ;;  %p220_p2 = scmp.lt.u32.totalorder %s216_s26, %s311_s3 }
  0x4a   :  { %p222_p3 = pnand %p220_p2, %p217_p1 }
  0x4c   :  { %225 = shalt.err (!%p222_p3)
}
  0x4d   :  { %120 = dma.vmem_to_hbm [thread:$0]  %s118_s12, 128, %s311_s3, [#allocation9]  }
  0x4e   :  { %230 = dma.done.wait [#allocation4], 128  }
  0x4f   :  { %231 = vsyncadd [#allocation4], 4294967168 }
  0x50   :  { %232 = dma.done.wait [#allocation9], 128  }
  0x51   :  { %233 = vsyncadd [#allocation9], 4294967168 }
  0x52   :  { %127 = vsyncpa [#allocation3], 1 }
  0x53   :  { %128 = vsyncpa [#allocation6], 1 }
  0x54   :  { %129 = vsyncpa [#allocation4], 1 }
  0x55   :  { %130 = vsyncpa [#allocation9], 1 }

</bundles_post_ra>
